<compile_context>
chip_gen: v5e
topology: v5e:2x2
jax: 0.10.0
libtpu: 0.0.40
codegen_flags: <defaults>
</compile_context>

<pallas_src>
import jax
import jax.numpy as jnp
from jax.experimental import pallas as pl
from jax.experimental.pallas import tpu as pltpu


def _identity_kernel(x_ref, o_ref):
    # Pure pass-through: the hot path of an empty forward() is "return input".
    o_ref[...] = x_ref[...]


_LANES = 128                         # full lane width -> unmasked vector stores
_TARGET_BLOCK_BYTES = 2 * 1024 * 1024  # ~2 MiB/block: near-roofline HBM copy BW
_ROW_ALIGN = 32                      # sublane packing granularity (f32/bf16/i8/fp8)


def _round_up(v, m):
    return ((v + m - 1) // m) * m


def model_forward(x):
    """Pallas equivalent of Model.forward (abstract stub -> identity copy)."""
    orig_shape = x.shape
    orig_dtype = x.dtype
    total = int(x.size)
    if total == 0:
        return x

    flat = x.reshape(-1)
    rem = total % _LANES
    padded = rem != 0
    if padded:
        # Only pay a host-side pad (of < 128 elements) when not lane-aligned.
        flat = jnp.pad(flat, (0, _LANES - rem))
    rows = flat.shape[0] // _LANES
    x2d = flat.reshape(rows, _LANES)

    itemsize = jnp.dtype(orig_dtype).itemsize
    candidate = max(
        _ROW_ALIGN,
        (_TARGET_BLOCK_BYTES // (_LANES * itemsize)) // _ROW_ALIGN * _ROW_ALIGN,
    )
    if rows > 2 * _ROW_ALIGN:
        # v7x has 2 TensorCores: keep the grid at >= 2 blocks when there is
        # enough data so dimension_semantics=("parallel",) can shard the copy.
        candidate = min(candidate, _round_up(pl.cdiv(rows, 2), _ROW_ALIGN))

    if rows <= candidate:
        tile_rows = rows       # single block == full array dim (always legal)
    else:
        tile_rows = candidate  # multiple of 32; ragged last block is masked

    grid = (pl.cdiv(rows, tile_rows),)

    out2d = pl.pallas_call(
        _identity_kernel,
        out_shape=jax.ShapeDtypeStruct((rows, _LANES), orig_dtype),
        grid=grid,
        in_specs=[pl.BlockSpec((tile_rows, _LANES), lambda i: (i, 0))],
        out_specs=pl.BlockSpec((tile_rows, _LANES), lambda i: (i, 0)),
        compiler_params=pltpu.CompilerParams(
            dimension_semantics=("parallel",),   # shards across 2 TCs on v7x
            vmem_limit_bytes=32 * 1024 * 1024,   # headroom for 2 MiB blocks, all gens
        ),
    )(x2d)

    out_flat = out2d.reshape(-1)
    if padded:
        out_flat = out_flat[:total]
    return out_flat.reshape(orig_shape)


if __name__ == "__main__":
    key = jax.random.PRNGKey(0)
    # Small NCHW input consistent with the module's generic image-style usage.
    x = jax.random.normal(key, (2, 4, 16, 16), dtype=jnp.float32)

    y = model_forward(x)
    jax.block_until_ready(y)

    # Sanity check: identity semantics (empty forward has nothing else to check).
    assert y.shape == x.shape and y.dtype == x.dtype
    assert bool(jnp.allclose(y, x))

    print("KERNEL_OK")
</pallas_src>

<mosaic_0001>
module attributes {stable_mosaic.version = 11 : i64} {
  func.func @_identity_kernel(%arg0: i32, %arg1: memref<16x128xf32, #tpu.memory_space<vmem>>, %arg2: memref<16x128xf32, #tpu.memory_space<vmem>>) attributes {dimension_semantics = [#tpu.dimension_semantics<parallel>], iteration_bounds = array<i64: 1>, scalar_prefetch = 0 : i64, scratch_operands = 0 : i64, tpu.core_type = #tpu.core_type<tc>, window_params = [{transform_indices = @transform_0, window_bounds = array<i64: 16, 128>}, {transform_indices = @transform_1, window_bounds = array<i64: 16, 128>}]} {
    %c0 = arith.constant 0 : index
    %c0_0 = arith.constant 0 : index
    %0 = vector.load %arg1[%c0, %c0_0] : memref<16x128xf32, #tpu.memory_space<vmem>>, vector<16x128xf32>
    %c0_1 = arith.constant 0 : index
    %c0_2 = arith.constant 0 : index
    %1 = vector.load %arg2[%c0_1, %c0_2] : memref<16x128xf32, #tpu.memory_space<vmem>>, vector<16x128xf32>
    tpu.vector_store %arg2[%c0_1, %c0_2], %0 {strides = array<i32>} : memref<16x128xf32, #tpu.memory_space<vmem>>, vector<16x128xf32>,
    return
  }
  func.func @transform_0(%arg0: i32) -> (i32, i32) {
    %c0_i32 = arith.constant 0 : i32
    %c0_i32_0 = arith.constant 0 : i32
    return %arg0, %c0_i32 : i32, i32
  }
  func.func @transform_1(%arg0: i32) -> (i32, i32) {
    %c0_i32 = arith.constant 0 : i32
    %c0_i32_0 = arith.constant 0 : i32
    return %arg0, %c0_i32 : i32, i32
  }
}

</mosaic_0001>

<bundles_post_ra>
// kernel: tpu_custom_call.1
= control target key start
LH: loop header
LB: loop body
LE: loop exit
PB: predicated region body
PF: predicated region fallthrough
CT: control target
= control target key end

     0   :  { %6 = vsyncpa [#allocation3], 0  ;;  %s124_s0 = inlined_call_operand.hbm [shape: f32[16,128], index: 0, kind: input, shape index: {}]   ;;  %s125_s1 = inlined_call_operand.hbm [shape: f32[16,128], index: 1, kind: output, shape index: {}]  }
   0x1   :  { %7 = vsyncpa [#allocation4], 0  ;;  %s12_s8 = sshll.u32 %s124_s0, 4  ;;  %s104_s9 = smov [#allocation2]   ;;  %s13_s8 = int_to_ptr.hbm [resolvable:$true] %s12_s8 }
   0x2   :  { %s14_s10 = sshll.u32 %s104_s9, 4  ;;  %s105_s11 = smov 128   ;;  %s15_s10 = int_to_ptr.vmem [resolvable:$true] %s14_s10 }
   0x3   :  { %s106_s12 = smov 8  }
   0x4   :  { %20 = dma.hbm_to_vmem [thread:$0]  %s13_s8, 256, %s15_s10, [#allocation3], %s105_s11, %s105_s11, %s106_s12  }
   0x5   :  { %100 = dma.done.wait [#allocation3], 256  }
   0x6   :  { %101 = vsyncadd [#allocation3], 4294967040  ;;  %s107_s13 = smov [#allocation5]   ;;  %s35_s17 = sshll.u32 %s125_s1, 4  ;;  %v25_v0 = vld [vmem:[#allocation2] sm:$0xff]  ;;  %v26_v1 = vld [vmem:[#allocation2 + $0x8] sm:$0xff]  ;;  %s36_s17 = int_to_ptr.hbm [resolvable:$true] %s35_s17 }
   0x7   :  { %s33_s14 = sshll.u32 %s107_s13, 4  ;;  %27 = vst [vmem:[#allocation5] sm:$0xff] %v25_v0  ;;  %s34_s14 = int_to_ptr.vmem [resolvable:$true] %s33_s14 }
   0x8   :  { %28 = vst [vmem:[#allocation5 + $0x8] sm:$0xff] %v26_v1 }
   0x9   :  { %41 = dma.vmem_to_hbm [thread:$0]  %s34_s14, 256, %s36_s17, [#allocation4], %s105_s11, %s105_s11, %s106_s12  }
   0xa   :  { %102 = dma.done.wait [#allocation4], 256  }
   0xb   :  { %103 = vsyncadd [#allocation4], 4294967040 }
   0xc   :  { %46 = vsyncpa [#allocation3], 1 }
   0xd   :  { %47 = vsyncpa [#allocation4], 1 }

</bundles_post_ra>
